<compile_context>
chip_gen: v5e
topology: v5e:2x2
jax: 0.10.0
libtpu: 0.0.40
codegen_flags: <defaults>
</compile_context>

<pallas_src>
import jax
import jax.numpy as jnp
from jax.experimental import pallas as pl
from jax.experimental.pallas import tpu as pltpu


def _round_up(x, m):
    return -(-x // m) * m


def _s_gcn_kernel(z_ref, w_ref, o_ref):
    """One (batch, lane-tile) block: lane-dense GEMM + ReLU.

    z_ref: (1, KC, L)     bf16, rows = (k, ci), lanes = merged (t, w)
    w_ref: (C_out, KC)    bf16, columns ordered (k, ci), bias folded in
    o_ref: (1, C_out, L)  output block (L is a multiple of 128 -> dense vst)
    """
    out = jnp.dot(w_ref[...], z_ref[0], preferred_element_type=jnp.float32)
    o_ref[0] = jnp.maximum(out, 0.0).astype(o_ref.dtype)


def s_gcn_forward(x, A, weight, bias, *, kernel_size, out_channels,
                  lane_tile=512, mxu_dtype=jnp.bfloat16, out_dtype=None):
    """x: (N, C_in, T, V), A: (K, V, V), weight: (K*C_out, C_in), bias: (K*C_out,)."""
    n, c_in, t, v = x.shape
    k = kernel_size
    c_out = out_channels
    assert A.shape == (k, v, v)
    assert weight.shape == (k * c_out, c_in)
    assert bias.shape == (k * c_out,)
    out_dtype = x.dtype if out_dtype is None else out_dtype

    # ---- wrapper-side layout plumbing (per perf review) ----------------------
    # Fold the conv bias into an extra all-ones input channel and pad the
    # channel count to a multiple of 16 (bf16 packs 2 rows per sublane).
    c_in_aug = c_in + 1
    c_in_p = _round_up(c_in_aug, 16)
    kc = k * c_in_p

    x_aug = jnp.concatenate(
        [x,
         jnp.ones((n, 1, t, v), x.dtype),
         jnp.zeros((n, c_in_p - c_in_aug, t, v), x.dtype)], axis=1)

    # Graph aggregation (small contraction over v, ~10% of total FLOPs) done by
    # XLA here so the Pallas kernel gets Z already lane-dense: rows = (k, ci),
    # lanes = merged (t, w).  This is the perf review's recommended structure
    # (kills the in-kernel masked-vst relayout, the 17+ MB zk temp, and the
    # V-wide lane-padded x tile).
    z = jnp.einsum('nitv,kvw->nkitw', x_aug, A)          # (N, K, c_in_p, T, V)
    z = z.reshape(n, kc, t * v).astype(mxu_dtype)        # (N, KC, T*V) lane-dense

    # Tile directly in merged (t*v) lane space: works for any (T, V), including
    # T=300, V=25 (pad T*V up to a multiple of the 128-aligned lane tile).
    tv = t * v
    l_tile = min(lane_tile, _round_up(tv, 128))
    assert l_tile % 128 == 0
    tv_p = _round_up(tv, l_tile)
    if tv_p != tv:
        z = jnp.pad(z, ((0, 0), (0, 0), (0, tv_p - tv)))
    num_lane_tiles = tv_p // l_tile

    # Weights: (K*C_out, C_in) + bias -> (C_out, K*c_in_p), columns ordered
    # (k, ci); bias sits in the "ones" channel column, zeros in pad columns.
    w3 = weight.reshape(k, c_out, c_in)
    w_aug = jnp.concatenate(
        [w3,
         bias.reshape(k, c_out, 1),
         jnp.zeros((k, c_out, c_in_p - c_in_aug), weight.dtype)], axis=-1)
    w_r = w_aug.transpose(1, 0, 2).reshape(c_out, kc).astype(mxu_dtype)

    out_flat = pl.pallas_call(
        _s_gcn_kernel,
        out_shape=jax.ShapeDtypeStruct((n, c_out, tv_p), out_dtype),
        grid_spec=pltpu.PrefetchScalarGridSpec(
            num_scalar_prefetch=0,
            grid=(n, num_lane_tiles),
            in_specs=[
                pl.BlockSpec((1, kc, l_tile), lambda i, j: (i, 0, j)),   # Z tile
                pl.BlockSpec((c_out, kc), lambda i, j: (0, 0)),          # W (resident)
            ],
            out_specs=pl.BlockSpec((1, c_out, l_tile), lambda i, j: (i, 0, j)),
        ),
        compiler_params=pltpu.CompilerParams(
            dimension_semantics=("parallel", "parallel"),   # megacore-friendly
            vmem_limit_bytes=32 * 1024 * 1024,              # explicit, ample headroom
        ),
    )(z, w_r)

    # Strip lane padding and restore (N, C_out, T, V); the reshape itself is
    # free (identical row-major bytes).
    out = out_flat[:, :, :tv].reshape(n, c_out, t, v)
    return out, A


def _reference(x, A, weight, bias, *, kernel_size, out_channels):
    n, c_in, t, v = x.shape
    k, c_out = kernel_size, out_channels
    y = jnp.einsum('oc,nctv->notv', weight, x) + bias[None, :, None, None]
    y = y.reshape(n, k, c_out, t, v)
    z = jnp.einsum('nkctv,kvw->nctw', y, A)
    return jnp.maximum(z, 0.0)


if __name__ == "__main__":
    N, C_IN, C_OUT, K, T, V = 2, 4, 8, 3, 16, 16

    key = jax.random.PRNGKey(0)
    kx, ka, kw, kb = jax.random.split(key, 4)

    x = jax.random.normal(kx, (N, C_IN, T, V), dtype=jnp.float32)
    A = jax.random.normal(ka, (K, V, V), dtype=jnp.float32)
    weight = 0.1 * jax.random.normal(kw, (K * C_OUT, C_IN), dtype=jnp.float32)
    bias = 0.1 * jax.random.normal(kb, (K * C_OUT,), dtype=jnp.float32)

    # lane_tile=128 exercises a (N, lane-tiles) = (2, 2) grid at this toy shape.
    out, A_out = s_gcn_forward(
        x, A, weight, bias, kernel_size=K, out_channels=C_OUT, lane_tile=128)
    out = jax.block_until_ready(out)

    ref = _reference(x, A, weight, bias, kernel_size=K, out_channels=C_OUT)
    assert out.shape == (N, C_OUT, T, V)
    # bf16 MXU operands (f32 accumulation) => compare against the f32 reference
    # with a tolerance sized for bf16 rounding of Z and W.
    assert jnp.allclose(out, ref, atol=5e-2, rtol=5e-2)
    assert A_out is A

    # Odd-shape check: exercises channel padding (c_in+1 -> 16), TV padding
    # (T*V = 35 -> 128) and the wrapper-side slice back to (T, V).
    N2, C2, CO2, K2, T2, V2 = 1, 3, 5, 2, 7, 5
    k2 = jax.random.split(jax.random.PRNGKey(1), 4)
    x2 = jax.random.normal(k2[0], (N2, C2, T2, V2), dtype=jnp.float32)
    A2 = jax.random.normal(k2[1], (K2, V2, V2), dtype=jnp.float32)
    w2 = 0.1 * jax.random.normal(k2[2], (K2 * CO2, C2), dtype=jnp.float32)
    b2 = 0.1 * jax.random.normal(k2[3], (K2 * CO2,), dtype=jnp.float32)
    out2, _ = s_gcn_forward(x2, A2, w2, b2, kernel_size=K2, out_channels=CO2)
    out2 = jax.block_until_ready(out2)
    ref2 = _reference(x2, A2, w2, b2, kernel_size=K2, out_channels=CO2)
    assert out2.shape == (N2, CO2, T2, V2)
    assert jnp.allclose(out2, ref2, atol=5e-2, rtol=5e-2)

    print("KERNEL_OK")
</pallas_src>

<mosaic_0001>
module attributes {stable_mosaic.version = 11 : i64} {
  func.func @_s_gcn_kernel(%arg0: i32, %arg1: i32, %arg2: memref<1x48x128xbf16, #tpu.memory_space<vmem>>, %arg3: memref<8x48xbf16, #tpu.memory_space<vmem>>, %arg4: memref<1x8x128xf32, #tpu.memory_space<vmem>>) attributes {dimension_semantics = [#tpu.dimension_semantics<parallel>, #tpu.dimension_semantics<parallel>], iteration_bounds = array<i64: 2, 2>, scalar_prefetch = 0 : i64, scratch_operands = 0 : i64, tpu.core_type = #tpu.core_type<tc>, window_params = [{transform_indices = @transform_0, window_bounds = array<i64: 1, 48, 128>}, {pipeline_mode = #tpu.pipeline_mode<synchronous>, transform_indices = @transform_1, window_bounds = array<i64: 8, 48>}, {transform_indices = @transform_2, window_bounds = array<i64: 1, 8, 128>}]} {
    %c0 = arith.constant 0 : index
    %c0_0 = arith.constant 0 : index
    %0 = vector.load %arg3[%c0, %c0_0] : memref<8x48xbf16, #tpu.memory_space<vmem>>, vector<8x48xbf16>
    %c0_1 = arith.constant 0 : index
    %c0_2 = arith.constant 0 : index
    %c0_3 = arith.constant 0 : index
    %1 = vector.load %arg2[%c0_1, %c0_2, %c0_3] : memref<1x48x128xbf16, #tpu.memory_space<vmem>>, vector<1x48x128xbf16>
    %2 = vector.shape_cast %1 : vector<1x48x128xbf16> to vector<48x128xbf16>
    %cst = arith.constant dense<0.000000e+00> : vector<8x128xf32>
    %3 = tpu.matmul %0, %2, %cst {dimension_numbers = #tpu.dot_dimension_numbers<[1], [0], [0], [1], [0, 0, 1, 1], [], []>} : vector<8x48xbf16>, vector<48x128xbf16>, vector<8x128xf32> -> vector<8x128xf32>
    %cst_4 = arith.constant 0.000000e+00 : f32
    %4 = vector.broadcast %cst_4 : f32 to vector<8x128xf32>
    %5 = arith.maximumf %3, %4 : vector<8x128xf32>
    %c0_5 = arith.constant 0 : index
    %c0_6 = arith.constant 0 : index
    %c0_7 = arith.constant 0 : index
    %6 = vector.load %arg4[%c0_5, %c0_6, %c0_7] : memref<1x8x128xf32, #tpu.memory_space<vmem>>, vector<1x8x128xf32>
    %7 = vector.shape_cast %6 : vector<1x8x128xf32> to vector<8x128xf32>
    %8 = vector.shape_cast %5 : vector<8x128xf32> to vector<1x8x128xf32>
    tpu.vector_store %arg4[%c0_5, %c0_6, %c0_7], %8 {strides = array<i32>} : memref<1x8x128xf32, #tpu.memory_space<vmem>>, vector<1x8x128xf32>,
    return
  }
  func.func @transform_0(%arg0: i32, %arg1: i32) -> (i32, i32, i32) {
    %c0_i32 = arith.constant 0 : i32
    %c0_i32_0 = arith.constant 0 : i32
    return %arg0, %c0_i32, %arg1 : i32, i32, i32
  }
  func.func @transform_1(%arg0: i32, %arg1: i32) -> (i32, i32) {
    %c0_i32 = arith.constant 0 : i32
    %c0_i32_0 = arith.constant 0 : i32
    %c0_i32_1 = arith.constant 0 : i32
    return %c0_i32, %c0_i32_0 : i32, i32
  }
  func.func @transform_2(%arg0: i32, %arg1: i32) -> (i32, i32, i32) {
    %c0_i32 = arith.constant 0 : i32
    %c0_i32_0 = arith.constant 0 : i32
    return %arg0, %c0_i32, %arg1 : i32, i32, i32
  }
}

</mosaic_0001>

<bundles_post_ra>
// kernel: tpu_custom_call.1
= control target key start
LH: loop header
LB: loop body
LE: loop exit
PB: predicated region body
PF: predicated region fallthrough
CT: control target
= control target key end

     0   :  { %s836_s0 = inlined_call_operand.hbm [shape: bf16[2,48,256], index: 0, kind: input, shape index: {}]   ;;  %s837_s1 = inlined_call_operand.hbm [shape: bf16[8,48], index: 1, kind: input, shape index: {}]   ;;  %s838_s2 = inlined_call_operand.hbm [shape: f32[2,8,256], index: 2, kind: output, shape index: {}]  }
   0x1   :  { %846 = sst [smem:[#allocation16_spill]] %s837_s1 }
   0x2   :  { %847 = sst [smem:[#allocation17_spill]] %s838_s2 }
   0x3   :  { %7 = vsyncpa [#allocation3], 0 }
   0x4   :  { %9 = vsyncpa [#allocation3 + $0x1], 0 }
   0x5   :  { %10 = vsyncpa [#allocation6], 0 }
   0x6   :  { %11 = vsyncpa [#allocation4], 0 }
   0x7   :  { %13 = vsyncpa [#allocation4 + $0x1], 0  ;;  %s662_s9 = smov 0   ;;  %s664_s10 = smov 0  }
   0x8   :  { %s666_s11 = smov 0   ;;  %s668_s12 = smov 0  }
   0x9   :  { %s670_s13 = smov 0   ;;  %s672_s14 = smov 0  }
   0xa   :  { %s674_s15 = smov 0   ;;  %s676_s16 = smov 0  }
   0xb LB: > { %848 = sst [smem:[#allocation11_spill]] %s613_s9  ;;  %s354_s17 = sadd.s32 4294967295, %s641_s16   ;;  %s641_s16 = sphi %s676_s16, %s19_s16   ;;  %s637_s15 = sphi %s674_s15, %s873_s15   ;;  %s633_s14 = sphi %s672_s14, %s868_s14   ;;  %s629_s13 = sphi %s670_s13, %s872_s13   ;;  %s625_s12 = sphi %s668_s12, %s867_s12   ;;  %s621_s11 = sphi %s666_s11, %s871_s11   ;;  %s617_s10 = sphi %s664_s10, %s870_s10   ;;  %s613_s9 = sphi %s662_s9, %s869_s9  }
   0xc   : > { %849 = sst [smem:[#allocation12_spill]] %s633_s14  ;;  %s355_s18 = sadd.s32 4294967294, %s641_s16  }
   0xd   : > { %850 = sst [smem:[#allocation13_spill]] %s641_s16  ;;  %p47_p0 = scmp.ne.s32.totalorder %s621_s11, %s617_s10 }
   0xe   : > { %p48_p1 = scmp.eq.s32.totalorder %s641_s16, 0  ;;  %p53_p2 = scmp.ne.s32.totalorder %s617_s10, %s613_s9 }
   0xf   : > { %p710_p3 = scmp.eq.s32.totalorder %s354_s17, 0  ;;  %p100_p4 = scmp.eq.s32.totalorder %s354_s17, 3 }
  0x10   : > { %p714_p5 = por %p48_p1, %p47_p0  ;;  %p106_p6 = scmp.eq.s32.totalorder %s355_s18, 3 }
  0x11   : > { %p720_p7 = por %p710_p3, %p53_p2  ;;  %p724_p8 = por %p100_p4, %p47_p0 }
  0x12   : > { %p728_p9 = por %p106_p6, %p53_p2  ;;  %p356_p10 = scmp.ge.s32.totalorder %s641_s16, 1 }
  0x13   : > { %p113_p11 = scmp.lt.s32.totalorder %s641_s16, 5  ;;  %s857_s1 = sld [smem:[#allocation16_spill]] }
  0x14   : > { %s855_s24 = scalar_select %p728_p9, 1, 0 }
  0x15   : > { %p737_p12 = pnand %p356_p10, %p113_p11  ;;  %s643_s29 = smov [#allocation5]  }
  0x16   : > { %856 = sst [smem:[#allocation14_spill]] %s855_s24  ;;  %s127_s30 = sshll.u32 %s643_s29, 4  ;;  %s128_s30 = int_to_ptr.vmem [resolvable:$true] %s127_s30 }
  0x17   : > { %p395_p13 = pneg %p737_p12  ;;  %p408_p0 = scmp.lt.s32.totalorder %s641_s16, 4 }
  0x18   : > { %s28_s4 = sadd.s32 1, %s633_s14  ;;  %s31_s5 = sadd.s32 1, %s637_s15 }
  0x19   : > { %s125_s27 = sshll.u32 %s857_s1, 4  ;;  %p396_p1 = pnand %p395_p13, %p710_p3  ;;  %s126_s27 = int_to_ptr.hbm [resolvable:$true] %s125_s27 }
  0x1a   : > { %p748_p2 = pnand %p408_p0, %p714_p5  ;;  %p29_p4 = scmp.ge.s32.totalorder %s28_s4, 2 }
  0x1b   : > { %398 = dma.hbm_to_vmem [thread:$0]  (!%p396_p1), %s126_s27, 64, %s128_s30, [#allocation6]  }
  0x1c   : > { %s138_s6 = sand.u32 1, %s621_s11   ;;  %s385_s7 = smul.u32 12, %s637_s15 }
  0x1d   : > { %s875_s4 = smov (%p29_p4, %s28_s4), 0  ;;  %s877_s5 = smov (!%p29_p4, %s31_s5), %s637_s15 }
  0x1e   : > { %860 = sst [smem:[#allocation15_spill]] %s875_s4  ;;  %s36_s8 = ssub.s32 %s633_s14, %s875_s4 }
  0x1f   : > { %p33_p6 = scmp.ge.s32.totalorder %s877_s5, 2  ;;  %s384_s17 = smul.u32 24, %s138_s6 }
  0x20   : > { %s146_s18 = sadd.s32 %s633_s14, %s385_s7  ;;  %s861_s4 = sadd.s32 1, %s621_s11 }
  0x21   : > { %s879_s5 = smov (%p33_p6, %s877_s5), 0  ;;  %s359_s21 = sshll.u32 %s146_s18, 2 }
  0x22   : > { %s35_s25 = ssub.s32 %s637_s15, %s879_s5  ;;  %s148_s29 = scalar_lea.hbm %s836_s0, %s359_s21 }
  0x23   : > { %s37_s30 = sor.u32 %s36_s8, %s35_s25  ;;  %s149_s19 = sshll.u32 %s148_s29, 4  ;;  %s150_s19 = int_to_ptr.hbm [resolvable:$true] %s149_s19 }
  0x24   : > { %p38_p5 = scmp.eq.s32.totalorder %s37_s30, 0  ;;  %s142_s1 = scalar_lea.vmem [#allocation2], %s384_s17 }
  0x25   : > { %s151_s24 = sshll.u32 %s142_s1, 4  ;;  %s139_s7 = scalar_lea.sflag [#allocation3], %s138_s6  ;;  %s152_s24 = int_to_ptr.vmem [resolvable:$true] %s151_s24 }
  0x26   : > { %s772_s9 = scalar_select %p38_p5, %s621_s11, %s861_s4  }
  0x27   : > { %s644_s14 = smov 128   ;;  %s645_s16 = smov 64  }
  0x28   : > { %s646_s2 = smov 4   ;;  %163 = sbr.rel (%p737_p12) target bundleno = 195 (0xc3), region = 28 }
  0x29   : > { %402 = dma.hbm_to_vmem [thread:$0]  (!%p748_p2), %s150_s19, 384, %s152_s24, %s139_s7, %s644_s14, %s645_s16, %s646_s2  }
  0x2a   : > { %s779_s8 = sand.u32 (!%p737_p12), 1, %s617_s10  }
  0x2b   : > { %s386_s1 = smul.u32 (!%p737_p12), 24, %s779_s8  ;;  %s166_s17 = scalar_lea.sflag (!%p737_p12), [#allocation3], %s779_s8 }
  0x2d   : > { %s169_s4 = scalar_lea.vmem [#allocation2], %s386_s1 }
  0x2e   : > { %600 = dma.done.wait (%p720_p7), %s166_s17, 384  }
  0x2f   : > { %602 = vsyncadd (%p720_p7), %s166_s17, 4294966912 }
  0x30   : > { %604 = dma.done.wait (%p710_p3), [#allocation6], 64  }
  0x31   : > { %606 = vsyncadd (%p710_p3), [#allocation6], 4294967232  ;;  %v383_v0 = vld [vmem:[%s169_s4 + $0x10] sm:$0xff]  ;;  %v382_v1 = vld [vmem:[%s169_s4 + $0x8] sm:$0xff]  ;;  %vm222_vm0 = vcmask 392192   ;;  %s377_s2 = sshll.u32 %s629_s13, 1 }
  0x32   : > { %231 = vmatpush.bf16.msra.mxu0 %v383_v0  ;;  %v381_v2 = vld [vmem:[%s169_s4] sm:$0xff]  ;;  %v197_v3 = vld [vmem:[#allocation5] sm:$0xf]  ;;  %s252_s14 = sadd.s32 %s625_s12, %s377_s2  ;;  %s362_s19 = sshll.u32 %s779_s8, 3 }
  0x33   : > { %s378_s16 = sshll.u32 %s252_s14, 3  ;;  %s862_s24 = sld [smem:[#allocation17_spill]] }
  0x34   : > { %s195_s3 = scalar_lea.vmem [#allocation7], %s362_s19  ;;  %s242_s21 = scalar_lea.sflag [#allocation4], %s779_s8 }
  0x35   : > { %s256_s6 = sshll.u32 %s195_s3, 4  ;;  %s257_s6 = int_to_ptr.vmem [resolvable:$true] %s256_s6 }
  0x36   : > { %232 = vmatpush.bf16.msra.mxu0 %v382_v1 }
  0x39   : > { %s254_s28 = scalar_lea.hbm %s862_s24, %s378_s16  ;;  %s559_s27 = scalar_lea.hbm %s862_s24, 32 }
  0x3a   : > { %233 = vmatpush.bf16.msra.mxu0 %v381_v2  ;;  %s258_s18 = sshll.u32 %s254_s28, 4  ;;  %s259_s18 = int_to_ptr.hbm [resolvable:$true] %s258_s18 }
  0x3b   : > { %s553_s25 = sshra.s32 %s259_s18, 4  ;;  %s554_s25 = int_to_ptr.hbm [resolvable:$true] %s553_s25 }
  0x3c   : > { %s555_s13 = scalar_lea.hbm %s554_s25, 8  ;;  %p560_p11 = scmp.lt.s32.totalorder %s554_s25, %s862_s24 }
  0x3d   : > { %375 = vmatmul.msk.bf16.vlgmr.msra.gmra.mxu0 %vm222_vm0, %v197_v3  ;;  %p556_p3 = scmp.ne.s32.totalorder %s554_s25, %s555_s13  ;;  %p561_p12 = scmp.lt.s32.totalorder %s559_s27, %s555_s13 }
  0x3f   : > { %p557_p7 = pnand %p556_p3, %p724_p8  ;;  %p562_p13 = por %p561_p12, %p560_p11 }
  0x41   : > { %p558_p10 = pneg %p557_p7 }
  0x43   : > { %p563_p0 = pnand %p562_p13, %p558_p10 }
  0xba   : > { %v235_v4 = vpop.f32.mrf.mxu0 }
  0xbb   : > { %v239_v5 = vmax.f32 %v235_v4, 0.0 }
  0xbd   : > { %240 = vst [vmem:[%s195_s3] sm:$0xff] %v239_v5 }
  0xbe   : > { %566 = shalt.err (!%p563_p0)
}
  0xbf   : > { %393 = dma.vmem_to_hbm [thread:$0]  (%p724_p8), %s257_s6, 128, %s259_s18, %s242_s21  }
  0xc2   : > { %v237_v6 = vpop.f32.mrf.mxu0 }
  0xc3 PF: > { %s863_s7 = sld [smem:[#allocation13_spill]] }
  0xc4   : > { %s864_s8 = sld [smem:[#allocation11_spill]] }
  0xc9   : > { %p410_p1 = scmp.ge.s32.totalorder %s863_s7, 2 }
  0xca   : > { %s270_s17 = sand.u32 1, %s864_s8  }
  0xcb   : > { %p404_p2 = pnand %p410_p1, %p728_p9  ;;  %s271_s4 = scalar_lea.sflag [#allocation4], %s270_s17 }
  0xcd   : > { %p405_p4 = pneg %p404_p2 }
  0xcf   : > { %608 = dma.done.wait (%p405_p4), %s271_s4, 128  }
  0xd0   : > { %610 = vsyncadd (%p405_p4), %s271_s4, 4294967168  ;;  %s19_s16 = sadd.s32 1, %s863_s7   ;;  %s866_s23 = smov %s772_s9 }
  0xd1   : > { %p16_p6 = scmp.ge.s32.totalorder %s19_s16, 6   ;;  %s867_s12 = sld [smem:[#allocation12_spill]] }
  0xd2   : > { %s868_s14 = sld [smem:[#allocation15_spill]]  ;;  %s869_s9 = smov %s617_s10 }
  0xd3   : > { %s870_s10 = smov %s621_s11  ;;  %s871_s11 = smov %s866_s23 }
  0xd4   : > { %s872_s13 = smov %s637_s15  ;;  %s873_s15 = smov %s879_s5 }
  0xd5   :  { %18 = sbr.rel (!%p16_p6) target bundleno = 11 (0xb), region = 77 }
  0xda   :  { %277 = vsyncpa [#allocation3], 1 }
  0xdb   :  { %279 = vsyncpa [#allocation3 + $0x1], 1 }
  0xdc   :  { %280 = vsyncpa [#allocation6], 1 }
  0xdd   :  { %281 = vsyncpa [#allocation4], 1 }
  0xde   :  { %283 = vsyncpa [#allocation4 + $0x1], 1 }

</bundles_post_ra>
